<compile_context>
chip_gen: v6e
topology: v6e:2x2x1
jax: 0.10.0
libtpu: 0.0.40
codegen_flags: <defaults>
</compile_context>

<pallas_src>
import jax
import jax.numpy as jnp
from jax.experimental import pallas as pl
from jax.experimental.pallas import tpu as pltpu

_LANE = 128


def _gated_act_kernel(x_ref, o_ref):
    # Compute in f32 (safe on v5e which lacks bf16 VPU/EUP; no-op for f32 input).
    x = x_ref[...].astype(jnp.float32)
    t = jnp.tanh(0.5 * x)                  # EUP
    # tanh(x) * sigmoid(x) == t*(1+t) / (1+t*t)   (half-angle identity, exact)
    num = t * (1.0 + t)                    # VALU
    den = 1.0 + t * t                      # VALU; den in [1, 2]
    r = pl.reciprocal(den, approx=True)    # cheap EUP vrcp
    r = r * (2.0 - den * r)                # one Newton step on the free VALU slots
    o_ref[...] = (num * r).astype(o_ref.dtype)


def _device_kind() -> str:
    try:
        return jax.devices()[0].device_kind.lower()
    except Exception:
        return ""


def _default_block_bytes(kind: str) -> int:
    if "7" in kind:      # v7x: ~3.2 TB/s HBM -> bigger tiles amortize per-step cost
        return 8 << 20
    if "v5" in kind:     # v5e: slower HBM, smaller default scoped VMEM
        return 2 << 20
    return 4 << 20       # v6e / unknown


def gated_activation_unit(x: jax.Array, *, max_lane: int = 4096,
                          target_block_bytes=None) -> jax.Array:
    """Elementwise tanh(x)*sigmoid(x) via a Pallas TPU streaming kernel."""
    orig_shape = x.shape
    orig_dtype = x.dtype
    kind = _device_kind()
    if target_block_bytes is None:
        target_block_bytes = _default_block_bytes(kind)

    flat = x.reshape(-1)
    n = flat.shape[0]

    # Pad only up to the next multiple of 128 lanes (block_shape, not the array,
    # must obey the (sublane, 128) rule).  Lane-aligned sizes skip this entirely.
    pad = (-n) % _LANE
    if pad:
        flat = jnp.pad(flat, (0, pad))
    n_pad = n + pad

    # Widest lane dimension: largest multiple of 128 dividing n_pad, capped.
    # Non-power-of-two widths (384, 640, ...) are allowed -> longer DMAs.
    m = n_pad // _LANE
    cap = max(1, max_lane // _LANE)
    wdiv = 1
    for d in range(min(m, cap), 0, -1):
        if m % d == 0:
            wdiv = d
            break
    width = wdiv * _LANE
    rows = n_pad // width
    x2d = flat.reshape(rows, width)

    # Sublane granularity matching the packed-dtype tile: 8 (f32) / 16 (bf16) / 32 (i8).
    itemsize = jnp.dtype(orig_dtype).itemsize
    sublane = 8 * max(1, 4 // max(1, itemsize))

    # Row tile sized to ~target_block_bytes, rounded to the sublane granularity.
    bytes_per_row = width * itemsize
    rt = max(sublane, (target_block_bytes // bytes_per_row) // sublane * sublane)
    if rows <= rt:
        rt = rows                     # single block; block dim == full dim is legal
    grid_steps = pl.cdiv(rows, rt)    # partial last block is masked by Pallas

    # Double-buffered in+out blocks plus headroom; fits every generation's VMEM.
    block_bytes = rt * width * itemsize
    vmem_limit = max(32 << 20, min(4 * block_bytes + (8 << 20), 48 << 20))

    def _call(semantics):
        return pl.pallas_call(
            _gated_act_kernel,
            out_shape=jax.ShapeDtypeStruct((rows, width), orig_dtype),
            grid=(grid_steps,),
            in_specs=[pl.BlockSpec((rt, width), lambda i: (i, 0))],
            out_specs=pl.BlockSpec((rt, width), lambda i: (i, 0)),
            compiler_params=pltpu.CompilerParams(
                dimension_semantics=(semantics,),
                vmem_limit_bytes=vmem_limit,
            ),
        )(x2d)

    # Shard the row grid across v7x's two TensorCores; no-op / unused elsewhere.
    if "7" in kind and grid_steps >= 2:
        try:
            out2d = _call(pltpu.CORE_PARALLEL)
        except Exception:
            out2d = _call("parallel")   # conservative fallback if lowering balks
    else:
        out2d = _call("parallel")

    out_flat = out2d.reshape(-1)
    if pad:
        out_flat = out_flat[:n]
    return out_flat.reshape(orig_shape)


if __name__ == "__main__":
    key = jax.random.PRNGKey(0)
    # NCHW input consistent with the conv-style module shape in the spec.
    x = jax.random.normal(key, (2, 4, 16, 16), dtype=jnp.float32)

    y = gated_activation_unit(x)
    y = jax.block_until_ready(y)

    # Reference check against the original formulation.
    y_ref = jnp.tanh(x) * jax.nn.sigmoid(x)
    assert y.shape == x.shape
    assert jnp.allclose(y, y_ref, atol=1e-5, rtol=1e-5)

    print("KERNEL_OK")
</pallas_src>

<mosaic_0001>
module attributes {stable_mosaic.version = 11 : i64} {
  func.func @_gated_act_kernel(%arg0: i32, %arg1: memref<1x2048xf32, #tpu.memory_space<vmem>>, %arg2: memref<1x2048xf32, #tpu.memory_space<vmem>>) attributes {dimension_semantics = [#tpu.dimension_semantics<parallel>], iteration_bounds = array<i64: 1>, scalar_prefetch = 0 : i64, scratch_operands = 0 : i64, tpu.core_type = #tpu.core_type<tc>, window_params = [{transform_indices = @transform_0, window_bounds = array<i64: 1, 2048>}, {transform_indices = @transform_1, window_bounds = array<i64: 1, 2048>}]} {
    %c0 = arith.constant 0 : index
    %c0_0 = arith.constant 0 : index
    %0 = vector.load %arg1[%c0, %c0_0] : memref<1x2048xf32, #tpu.memory_space<vmem>>, vector<1x2048xf32>
    %cst = arith.constant 5.000000e-01 : f32
    %1 = vector.broadcast %cst : f32 to vector<1x2048xf32>
    %2 = arith.mulf %1, %0 : vector<1x2048xf32>
    %3 = math.tanh %2 : vector<1x2048xf32>
    %cst_1 = arith.constant 1.000000e+00 : f32
    %4 = vector.broadcast %cst_1 : f32 to vector<1x2048xf32>
    %5 = arith.addf %4, %3 : vector<1x2048xf32>
    %6 = arith.mulf %3, %5 : vector<1x2048xf32>
    %7 = arith.mulf %3, %3 : vector<1x2048xf32>
    %cst_2 = arith.constant 1.000000e+00 : f32
    %8 = vector.broadcast %cst_2 : f32 to vector<1x2048xf32>
    %9 = arith.addf %8, %7 : vector<1x2048xf32>
    %10 = tpu.reciprocal %9 {approx = true} : vector<1x2048xf32> -> vector<1x2048xf32>
    %11 = arith.mulf %9, %10 : vector<1x2048xf32>
    %cst_3 = arith.constant 2.000000e+00 : f32
    %12 = vector.broadcast %cst_3 : f32 to vector<1x2048xf32>
    %13 = arith.subf %12, %11 : vector<1x2048xf32>
    %14 = arith.mulf %10, %13 : vector<1x2048xf32>
    %15 = arith.mulf %6, %14 : vector<1x2048xf32>
    %c0_4 = arith.constant 0 : index
    %c0_5 = arith.constant 0 : index
    %16 = vector.load %arg2[%c0_4, %c0_5] : memref<1x2048xf32, #tpu.memory_space<vmem>>, vector<1x2048xf32>
    tpu.vector_store %arg2[%c0_4, %c0_5], %15 {strides = array<i32>} : memref<1x2048xf32, #tpu.memory_space<vmem>>, vector<1x2048xf32>,
    return
  }
  func.func @transform_0(%arg0: i32) -> (i32, i32) {
    %c0_i32 = arith.constant 0 : i32
    %c0_i32_0 = arith.constant 0 : i32
    return %arg0, %c0_i32 : i32, i32
  }
  func.func @transform_1(%arg0: i32) -> (i32, i32) {
    %c0_i32 = arith.constant 0 : i32
    %c0_i32_0 = arith.constant 0 : i32
    return %arg0, %c0_i32 : i32, i32
  }
}

</mosaic_0001>

<bundles_post_ra>
// kernel: tpu_custom_call.1
= control target key start
LH: loop header
LB: loop body
LE: loop exit
PB: predicated region body
PF: predicated region fallthrough
CT: control target
= control target key end

     0   :  { %6 = vsyncpa [#allocation3], 0  ;;  %s134_s0 = inlined_call_operand.hbm [shape: f32[1,2048], index: 0, kind: input, shape index: {}]   ;;  %s135_s1 = inlined_call_operand.hbm [shape: f32[1,2048], index: 1, kind: output, shape index: {}]  }
   0x1   :  { %7 = vsyncpa [#allocation4], 0  ;;  %s116_s6 = smov [#allocation2]  }
   0x2   :  { %s14_s7 = sshll.u32 %s116_s6, 4  ;;  %s15_s7 = int_to_ptr.vmem [resolvable:$true] %s14_s7 }
   0x3   :  { %s80_s8 = scalar_lea.vmem %s15_s7, 256  ;;  %p85_p1 = scmp.lt.s32.totalorder %s15_s7, %s15_s7 }
   0x4   :  { %p81_p0 = scmp.ne.s32.totalorder %s15_s7, %s80_s8  ;;  %p86_p2 = scmp.lt.s32.totalorder %s80_s8, %s80_s8 }
   0x6   :  { %p87_p3 = por %p86_p2, %p85_p1 }
   0x8   :  { %p88_p4 = pnand %p87_p3, %p81_p0 }
   0xa   :  { %91 = shalt.err (!%p88_p4)
}
   0xb   :  { %17 = dma.hbm_to_vmem [thread:$0]  %s134_s0, 256, %s15_s7, [#allocation3]  }
   0xc   :  { %112 = dma.done.wait [#allocation3], 256  }
   0xd   :  { %113 = vsyncadd [#allocation3], 4294967040  ;;  %v21_v0 = vld [vmem:[#allocation2] sm:$0xff]  ;;  %v22_v1 = vld [vmem:[#allocation2 + $0x8] sm:$0xff]  ;;  %s117_s0 = smov [#allocation5]  }
   0xe   :  { %v23_v2 = vmul.f32 0.5, %v21_v0  ;;  %v24_v3 = vmul.f32 0.5, %v22_v1  ;;  %s53_s11 = sshll.u32 %s117_s0, 4  ;;  %s54_s11 = int_to_ptr.vmem [resolvable:$true] %s53_s11 }
   0xf   :  { %s92_s12 = scalar_lea.vmem %s54_s11, 256  ;;  %p97_p6 = scmp.lt.s32.totalorder %s54_s11, %s54_s11 }
  0x10   :  { %64 = vtanh.f32 %v23_v2  ;;  %p93_p5 = scmp.ne.s32.totalorder %s54_s11, %s92_s12  ;;  %p98_p7 = scmp.lt.s32.totalorder %s92_s12, %s92_s12 }
  0x11   :  { %66 = vtanh.f32 %v24_v3 }
  0x12   :  { %p99_p8 = por %p98_p7, %p97_p6 }
  0x14   :  { %p100_p9 = pnand %p99_p8, %p93_p5 }
  0x1d   :  { %v65_v4 = vpop.eup %64 }
  0x1e   :  { %v67_v5 = vpop.eup %66  ;;  %v31_v6 = vmul.f32 %v65_v4, %v65_v4  ;;  %v27_v10 = vadd.f32 1.0, %v65_v4 }
  0x1f   :  { %v32_v7 = vmul.f32 %v67_v5, %v67_v5  ;;  %v28_v12 = vadd.f32 1.0, %v67_v5 }
  0x20   :  { %v33_v8 = vadd.f32 1.0, %v31_v6  ;;  %v29_v16 = vmul.f32 %v65_v4, %v27_v10 }
  0x21   :  { %v34_v9 = vadd.f32 1.0, %v32_v7  ;;  %v30_v18 = vmul.f32 %v67_v5, %v28_v12 }
  0x22   :  { %68 = vrcp.f32 %v33_v8 }
  0x23   :  { %70 = vrcp.f32 %v34_v9 }
  0x2f   :  { %v69_v11 = vpop.eup %68 }
  0x30   :  { %v71_v13 = vpop.eup %70  ;;  %v37_v14 = vmul.f32 %v69_v11, %v33_v8 }
  0x31   :  { %v38_v15 = vmul.f32 %v71_v13, %v34_v9 }
  0x32   :  { %v39_v17 = vsub.f32 2.0, %v37_v14 }
  0x33   :  { %v40_v19 = vsub.f32 2.0, %v38_v15 }
  0x34   :  { %v41_v20 = vmul.f32 %v69_v11, %v39_v17 }
  0x35   :  { %v42_v21 = vmul.f32 %v71_v13, %v40_v19 }
  0x36   :  { %v43_v22 = vmul.f32 %v41_v20, %v29_v16 }
  0x37   :  { %v44_v23 = vmul.f32 %v42_v21, %v30_v18 }
  0x38   :  { %45 = vst [vmem:[#allocation5] sm:$0xff] %v43_v22 }
  0x39   :  { %46 = vst [vmem:[#allocation5 + $0x8] sm:$0xff] %v44_v23 }
  0x3a   :  { %103 = shalt.err (!%p100_p9)
}
  0x3b   :  { %56 = dma.vmem_to_hbm [thread:$0]  %s54_s11, 256, %s135_s1, [#allocation4]  }
  0x3c   :  { %114 = dma.done.wait [#allocation4], 256  }
  0x3d   :  { %115 = vsyncadd [#allocation4], 4294967040 }
  0x3e   :  { %60 = vsyncpa [#allocation3], 1 }
  0x3f   :  { %61 = vsyncpa [#allocation4], 1 }

</bundles_post_ra>
